<compile_context>
chip_gen: v5e
topology: v5e:2x2
jax: 0.10.0
libtpu: 0.0.40
codegen_flags: <defaults>
</compile_context>

<pallas_src>
import functools

import jax
import jax.numpy as jnp
from jax.experimental import pallas as pl
from jax.experimental.pallas import tpu as pltpu


def _round_up(x, m):
    return (x + m - 1) // m * m


def _cdiv(a, b):
    return (a + b - 1) // b


def _wnconv_kernel(x_ref, w_ref, b_ref, o_ref, *, taps, ts):
    """One (batch, spatial-tile) grid step of the fused weight-norm conv.

    x_ref : (NT+1, C, TS)  padded image of this batch element, flattened
                           spatially and chunked into TS-wide lane chunks.
    w_ref : (KH*KW, O, C)  per-tap effective weights (already scaled by g/||v||).
    b_ref : (O, 1)         bias (f32).
    o_ref : (O, TS)        output tile; lanes = spatial (dense multiple of 128).
    """
    t = pl.program_id(1)
    # Two consecutive TS-wide chunks cover every shifted window needed by the
    # taps of this tile (max tap offset <= TS by construction in the wrapper).
    xa = x_ref[t]                                     # (C, TS)
    xb = x_ref[t + 1]                                 # (C, TS)
    xw = jnp.concatenate([xa, xb], axis=-1)           # (C, 2*TS)

    acc = jnp.zeros(o_ref.shape, jnp.float32)
    for k, off in enumerate(taps):                    # static, unrolled KH*KW taps
        acc = acc + jnp.dot(w_ref[k], xw[:, off:off + ts],
                            preferred_element_type=jnp.float32)
    o_ref[...] = (acc + b_ref[...]).astype(o_ref.dtype)


@functools.partial(jax.jit,
                   static_argnames=("kernel_size", "padding", "compute_dtype"))
def wn_conv2d(x, v, g, b, *, kernel_size, padding, compute_dtype=jnp.float32):
    """Weight-normalized Conv2d forward (stride 1).

    x : (N, C, H, W) float32
    v : (O, C, KH, KW) un-normalized conv weight
    g : (O,)           weight-norm gain
    b : (O,)           bias
    returns (N, O, Ho, Wo) float32  (NCHW, matching the PyTorch module)
    """
    n, c, h, w = x.shape
    o, ci, kh, kw = v.shape
    assert ci == c and kh == kernel_size and kw == kernel_size
    p = padding
    hp, wp = h + 2 * p, w + 2 * p
    ho, wo = hp - kh + 1, wp - kw + 1
    assert ho > 0 and wo > 0

    # ---- weight norm hoisted out of the grid loop (computed once, tiny) ----
    vf = v.astype(jnp.float32)
    norm_sq = jnp.sum(vf * vf, axis=(1, 2, 3), keepdims=True)           # (O,1,1,1)
    scale = jnp.where(norm_sq > 0.0,
                      g.astype(jnp.float32)[:, None, None, None]
                      * jax.lax.rsqrt(norm_sq),
                      0.0)
    w_eff = (vf * scale).astype(compute_dtype)                          # (O,C,KH,KW)
    w_taps = jnp.transpose(w_eff, (2, 3, 0, 1)).reshape(kh * kw, o, c)  # (T,O,C)
    b2 = b.astype(jnp.float32).reshape(o, 1)

    # ---- spatial tiling over "wide" rows (width Wp) ----
    s_wide = ho * wp                       # valid wide-output extent per image
    shift = (kh - 1) * wp + (kw - 1)       # largest tap offset
    # Cap the tile so the per-step working set (2 chunks + f32 accumulator)
    # stays a few MiB; then aim for big tiles but >= 4 total grid steps
    # (amortize per-step overhead, let megacore split across TensorCores).
    bytes_per_col = 4 * (3 * c + o)
    ts_cap = max(128, min(2048, (4 << 20) // bytes_per_col // 128 * 128))
    nt = max(1, _cdiv(s_wide, ts_cap))
    while n * nt < 4 and nt < _cdiv(s_wide, 128):
        nt += 1
    ts = _round_up(_cdiv(s_wide, nt), 128)
    ts = max(ts, _round_up(shift, 128))    # 2-chunk window must cover all taps
    nt = _cdiv(s_wide, ts)
    sp = nt * ts
    l_in = (nt + 1) * ts                   # flat input length incl. tail slack

    # ---- input staging: pad + reshape + chunk (fused XLA passes; no im2col,
    #      no zeros + dynamic-update-slice round trip) ----
    xpad = jnp.pad(x, ((0, 0), (0, 0), (p, p), (p, p)))                 # (N,C,Hp,Wp)
    xf = xpad.reshape(n, c, hp * wp)
    xf = jnp.pad(xf, ((0, 0), (0, 0), (0, l_in - hp * wp)))
    xch = jnp.transpose(xf.reshape(n, c, nt + 1, ts),
                        (0, 2, 1, 3)).astype(compute_dtype)             # (N,NT+1,C,TS)

    taps = tuple(i * wp + j for i in range(kh) for j in range(kw))
    kern = functools.partial(_wnconv_kernel, taps=taps, ts=ts)

    # Scoped-VMEM estimate: resident image block + double-buffered output tile
    # + resident weights/bias + in-kernel temporaries.  Only raise the limit
    # when the default (32 MiB) would be exceeded.
    item = jnp.dtype(compute_dtype).itemsize
    x_block_bytes = (nt + 1) * c * ts * item
    w_bytes = kh * kw * o * c * item + o * 4
    out_block_bytes = o * ts * 4
    tmp_bytes = (3 * c * item + o * 4) * ts
    vmem_est = 2 * (x_block_bytes + out_block_bytes) + 2 * w_bytes + tmp_bytes
    vmem_limit = None
    if vmem_est > (30 << 20):
        # TODO(synk): for very large C (K = C*KH*KW) add a channel-block grid
        # axis marked "arbitrary" with an f32 VMEM accumulator so the per-batch
        # image block stays within v7x's smaller (64 MiB) VMEM budget.
        vmem_limit = min(64 << 20, _round_up(vmem_est + (2 << 20), 1 << 20))

    cost = pl.CostEstimate(
        flops=2 * n * o * c * kh * kw * ho * wp,
        transcendentals=0,
        bytes_accessed=(n * (nt + 1) * c * ts * item   # x stream
                        + kh * kw * o * c * item       # weights
                        + n * o * sp * 4))             # output stream

    out_wide = pl.pallas_call(
        kern,
        out_shape=jax.ShapeDtypeStruct((n, o, sp), jnp.float32),
        grid_spec=pltpu.PrefetchScalarGridSpec(
            num_scalar_prefetch=0,
            grid=(n, nt),
            in_specs=[
                # whole padded image of batch nn, resident across its spatial tiles
                pl.BlockSpec((None, nt + 1, c, ts), lambda nn, tt: (nn, 0, 0, 0)),
                # per-tap weights and bias: fetched once, kept resident
                pl.BlockSpec((kh * kw, o, c), lambda nn, tt: (0, 0, 0)),
                pl.BlockSpec((o, 1), lambda nn, tt: (0, 0)),
            ],
            out_specs=pl.BlockSpec((None, o, ts), lambda nn, tt: (nn, 0, tt)),
        ),
        compiler_params=pltpu.CompilerParams(
            dimension_semantics=("parallel", "parallel"),
            vmem_limit_bytes=vmem_limit),
        cost_estimate=cost,
    )(xch, w_taps, b2)

    # Drop garbage right-edge columns of the "wide" rows; already NCHW-ordered,
    # so no transpose is needed.
    out = out_wide[:, :, : ho * wp].reshape(n, o, ho, wp)[:, :, :, :wo]
    return out


def wn_conv2d_reference(x, v, g, b, *, padding):
    """Plain-JAX reference matching torch weight_norm + Conv2d semantics."""
    norm = jnp.sqrt(jnp.sum(v * v, axis=(1, 2, 3), keepdims=True))
    wgt = g[:, None, None, None] * v / norm
    out = jax.lax.conv_general_dilated(
        x, wgt, window_strides=(1, 1),
        padding=[(padding, padding), (padding, padding)],
        dimension_numbers=("NCHW", "OIHW", "NCHW"))
    return out + b[None, :, None, None]


if __name__ == "__main__":
    key = jax.random.PRNGKey(0)
    k_x, k_v, k_b = jax.random.split(key, 3)

    N, C_IN, C_OUT, H, W = 2, 4, 8, 16, 16
    KS, PAD = 3, 1

    x = jax.random.normal(k_x, (N, C_IN, H, W), jnp.float32)
    # PyTorch weight_norm init: g = ||v|| per output channel.
    v = 0.1 * jax.random.normal(k_v, (C_OUT, C_IN, KS, KS), jnp.float32)
    g = jnp.sqrt(jnp.sum(v * v, axis=(1, 2, 3)))
    b = 0.05 * jax.random.normal(k_b, (C_OUT,), jnp.float32)

    ref = wn_conv2d_reference(x, v, g, b, padding=PAD)

    # float32 compute path
    out = wn_conv2d(x, v, g, b, kernel_size=KS, padding=PAD,
                    compute_dtype=jnp.float32)
    out = jax.block_until_ready(out)
    assert out.shape == (N, C_OUT, H, W), out.shape
    err = float(jnp.max(jnp.abs(out - ref)))
    assert err < 2e-4, err

    # bfloat16 matmul-input path (f32 accumulation) -- halves HBM traffic on
    # the dominant input/weight streams in the mem-bound regime.
    out_bf16 = wn_conv2d(x, v, g, b, kernel_size=KS, padding=PAD,
                         compute_dtype=jnp.bfloat16)
    out_bf16 = jax.block_until_ready(out_bf16)
    err_bf16 = float(jnp.max(jnp.abs(out_bf16 - ref)))
    assert err_bf16 < 5e-2, err_bf16

    print("KERNEL_OK")
</pallas_src>

<mosaic_0001>
module attributes {stable_mosaic.version = 11 : i64} {
  func.func @_wnconv_kernel(%arg0: i32, %arg1: i32, %arg2: memref<1x3x4x256xf32, #tpu.memory_space<vmem>>, %arg3: memref<9x8x4xf32, #tpu.memory_space<vmem>>, %arg4: memref<8x1xf32, #tpu.memory_space<vmem>>, %arg5: memref<1x8x256xf32, #tpu.memory_space<vmem>>) attributes {dimension_semantics = [#tpu.dimension_semantics<parallel>, #tpu.dimension_semantics<parallel>], iteration_bounds = array<i64: 2, 2>, scalar_prefetch = 0 : i64, scratch_operands = 0 : i64, tpu.core_type = #tpu.core_type<tc>, window_params = [{transform_indices = @transform_0, window_bounds = array<i64: 1, 3, 4, 256>}, {pipeline_mode = #tpu.pipeline_mode<synchronous>, transform_indices = @transform_1, window_bounds = array<i64: 9, 8, 4>}, {pipeline_mode = #tpu.pipeline_mode<synchronous>, transform_indices = @transform_2, window_bounds = array<i64: 8, 1>}, {transform_indices = @transform_3, window_bounds = array<i64: 1, 8, 256>}]} {
    %c0 = arith.constant 0 : index
    %0 = arith.index_cast %arg1 : i32 to index
    %c0_0 = arith.constant 0 : index
    %c0_1 = arith.constant 0 : index
    %1 = vector.load %arg2[%c0, %0, %c0_0, %c0_1] : memref<1x3x4x256xf32, #tpu.memory_space<vmem>>, vector<1x1x4x256xf32>
    %2 = vector.shape_cast %1 : vector<1x1x4x256xf32> to vector<4x256xf32>
    %c1_i32 = arith.constant 1 : i32
    %3 = arith.addi %arg1, %c1_i32 : i32
    %c0_2 = arith.constant 0 : index
    %4 = arith.index_cast %3 : i32 to index
    %c0_3 = arith.constant 0 : index
    %c0_4 = arith.constant 0 : index
    %5 = vector.load %arg2[%c0_2, %4, %c0_3, %c0_4] : memref<1x3x4x256xf32, #tpu.memory_space<vmem>>, vector<1x1x4x256xf32>
    %6 = vector.shape_cast %5 : vector<1x1x4x256xf32> to vector<4x256xf32>
    %7 = tpu.concatenate %2, %6 in 1 : vector<4x256xf32>, vector<4x256xf32> -> vector<4x512xf32>
    %cst = arith.constant 0.000000e+00 : f32
    %8 = vector.broadcast %cst : f32 to vector<8x256xf32>
    %c0_5 = arith.constant 0 : index
    %c0_6 = arith.constant 0 : index
    %c0_7 = arith.constant 0 : index
    %9 = vector.load %arg3[%c0_5, %c0_6, %c0_7] : memref<9x8x4xf32, #tpu.memory_space<vmem>>, vector<1x8x4xf32>
    %10 = vector.shape_cast %9 : vector<1x8x4xf32> to vector<8x4xf32>
    %11 = vector.extract_strided_slice %7 {offsets = [0, 0], sizes = [4, 256], strides = [1, 1]} : vector<4x512xf32> to vector<4x256xf32>
    %cst_8 = arith.constant dense<0.000000e+00> : vector<8x256xf32>
    %12 = tpu.matmul %10, %11, %cst_8 {dimension_numbers = #tpu.dot_dimension_numbers<[1], [0], [0], [1], [0, 0, 1, 1], [], []>} : vector<8x4xf32>, vector<4x256xf32>, vector<8x256xf32> -> vector<8x256xf32>
    %13 = arith.addf %8, %12 : vector<8x256xf32>
    %c1 = arith.constant 1 : index
    %c0_9 = arith.constant 0 : index
    %c0_10 = arith.constant 0 : index
    %14 = vector.load %arg3[%c1, %c0_9, %c0_10] : memref<9x8x4xf32, #tpu.memory_space<vmem>>, vector<1x8x4xf32>
    %15 = vector.shape_cast %14 : vector<1x8x4xf32> to vector<8x4xf32>
    %16 = vector.extract_strided_slice %7 {offsets = [0, 1], sizes = [4, 256], strides = [1, 1]} : vector<4x512xf32> to vector<4x256xf32>
    %cst_11 = arith.constant dense<0.000000e+00> : vector<8x256xf32>
    %17 = tpu.matmul %15, %16, %cst_11 {dimension_numbers = #tpu.dot_dimension_numbers<[1], [0], [0], [1], [0, 0, 1, 1], [], []>} : vector<8x4xf32>, vector<4x256xf32>, vector<8x256xf32> -> vector<8x256xf32>
    %18 = arith.addf %13, %17 : vector<8x256xf32>
    %c2 = arith.constant 2 : index
    %c0_12 = arith.constant 0 : index
    %c0_13 = arith.constant 0 : index
    %19 = vector.load %arg3[%c2, %c0_12, %c0_13] : memref<9x8x4xf32, #tpu.memory_space<vmem>>, vector<1x8x4xf32>
    %20 = vector.shape_cast %19 : vector<1x8x4xf32> to vector<8x4xf32>
    %21 = vector.extract_strided_slice %7 {offsets = [0, 2], sizes = [4, 256], strides = [1, 1]} : vector<4x512xf32> to vector<4x256xf32>
    %cst_14 = arith.constant dense<0.000000e+00> : vector<8x256xf32>
    %22 = tpu.matmul %20, %21, %cst_14 {dimension_numbers = #tpu.dot_dimension_numbers<[1], [0], [0], [1], [0, 0, 1, 1], [], []>} : vector<8x4xf32>, vector<4x256xf32>, vector<8x256xf32> -> vector<8x256xf32>
    %23 = arith.addf %18, %22 : vector<8x256xf32>
    %c3 = arith.constant 3 : index
    %c0_15 = arith.constant 0 : index
    %c0_16 = arith.constant 0 : index
    %24 = vector.load %arg3[%c3, %c0_15, %c0_16] : memref<9x8x4xf32, #tpu.memory_space<vmem>>, vector<1x8x4xf32>
    %25 = vector.shape_cast %24 : vector<1x8x4xf32> to vector<8x4xf32>
    %26 = vector.extract_strided_slice %7 {offsets = [0, 18], sizes = [4, 256], strides = [1, 1]} : vector<4x512xf32> to vector<4x256xf32>
    %cst_17 = arith.constant dense<0.000000e+00> : vector<8x256xf32>
    %27 = tpu.matmul %25, %26, %cst_17 {dimension_numbers = #tpu.dot_dimension_numbers<[1], [0], [0], [1], [0, 0, 1, 1], [], []>} : vector<8x4xf32>, vector<4x256xf32>, vector<8x256xf32> -> vector<8x256xf32>
    %28 = arith.addf %23, %27 : vector<8x256xf32>
    %c4 = arith.constant 4 : index
    %c0_18 = arith.constant 0 : index
    %c0_19 = arith.constant 0 : index
    %29 = vector.load %arg3[%c4, %c0_18, %c0_19] : memref<9x8x4xf32, #tpu.memory_space<vmem>>, vector<1x8x4xf32>
    %30 = vector.shape_cast %29 : vector<1x8x4xf32> to vector<8x4xf32>
    %31 = vector.extract_strided_slice %7 {offsets = [0, 19], sizes = [4, 256], strides = [1, 1]} : vector<4x512xf32> to vector<4x256xf32>
    %cst_20 = arith.constant dense<0.000000e+00> : vector<8x256xf32>
    %32 = tpu.matmul %30, %31, %cst_20 {dimension_numbers = #tpu.dot_dimension_numbers<[1], [0], [0], [1], [0, 0, 1, 1], [], []>} : vector<8x4xf32>, vector<4x256xf32>, vector<8x256xf32> -> vector<8x256xf32>
    %33 = arith.addf %28, %32 : vector<8x256xf32>
    %c5 = arith.constant 5 : index
    %c0_21 = arith.constant 0 : index
    %c0_22 = arith.constant 0 : index
    %34 = vector.load %arg3[%c5, %c0_21, %c0_22] : memref<9x8x4xf32, #tpu.memory_space<vmem>>, vector<1x8x4xf32>
    %35 = vector.shape_cast %34 : vector<1x8x4xf32> to vector<8x4xf32>
    %36 = vector.extract_strided_slice %7 {offsets = [0, 20], sizes = [4, 256], strides = [1, 1]} : vector<4x512xf32> to vector<4x256xf32>
    %cst_23 = arith.constant dense<0.000000e+00> : vector<8x256xf32>
    %37 = tpu.matmul %35, %36, %cst_23 {dimension_numbers = #tpu.dot_dimension_numbers<[1], [0], [0], [1], [0, 0, 1, 1], [], []>} : vector<8x4xf32>, vector<4x256xf32>, vector<8x256xf32> -> vector<8x256xf32>
    %38 = arith.addf %33, %37 : vector<8x256xf32>
    %c6 = arith.constant 6 : index
    %c0_24 = arith.constant 0 : index
    %c0_25 = arith.constant 0 : index
    %39 = vector.load %arg3[%c6, %c0_24, %c0_25] : memref<9x8x4xf32, #tpu.memory_space<vmem>>, vector<1x8x4xf32>
    %40 = vector.shape_cast %39 : vector<1x8x4xf32> to vector<8x4xf32>
    %41 = vector.extract_strided_slice %7 {offsets = [0, 36], sizes = [4, 256], strides = [1, 1]} : vector<4x512xf32> to vector<4x256xf32>
    %cst_26 = arith.constant dense<0.000000e+00> : vector<8x256xf32>
    %42 = tpu.matmul %40, %41, %cst_26 {dimension_numbers = #tpu.dot_dimension_numbers<[1], [0], [0], [1], [0, 0, 1, 1], [], []>} : vector<8x4xf32>, vector<4x256xf32>, vector<8x256xf32> -> vector<8x256xf32>
    %43 = arith.addf %38, %42 : vector<8x256xf32>
    %c7 = arith.constant 7 : index
    %c0_27 = arith.constant 0 : index
    %c0_28 = arith.constant 0 : index
    %44 = vector.load %arg3[%c7, %c0_27, %c0_28] : memref<9x8x4xf32, #tpu.memory_space<vmem>>, vector<1x8x4xf32>
    %45 = vector.shape_cast %44 : vector<1x8x4xf32> to vector<8x4xf32>
    %46 = vector.extract_strided_slice %7 {offsets = [0, 37], sizes = [4, 256], strides = [1, 1]} : vector<4x512xf32> to vector<4x256xf32>
    %cst_29 = arith.constant dense<0.000000e+00> : vector<8x256xf32>
    %47 = tpu.matmul %45, %46, %cst_29 {dimension_numbers = #tpu.dot_dimension_numbers<[1], [0], [0], [1], [0, 0, 1, 1], [], []>} : vector<8x4xf32>, vector<4x256xf32>, vector<8x256xf32> -> vector<8x256xf32>
    %48 = arith.addf %43, %47 : vector<8x256xf32>
    %c8 = arith.constant 8 : index
    %c0_30 = arith.constant 0 : index
    %c0_31 = arith.constant 0 : index
    %49 = vector.load %arg3[%c8, %c0_30, %c0_31] : memref<9x8x4xf32, #tpu.memory_space<vmem>>, vector<1x8x4xf32>
    %50 = vector.shape_cast %49 : vector<1x8x4xf32> to vector<8x4xf32>
    %51 = vector.extract_strided_slice %7 {offsets = [0, 38], sizes = [4, 256], strides = [1, 1]} : vector<4x512xf32> to vector<4x256xf32>
    %cst_32 = arith.constant dense<0.000000e+00> : vector<8x256xf32>
    %52 = tpu.matmul %50, %51, %cst_32 {dimension_numbers = #tpu.dot_dimension_numbers<[1], [0], [0], [1], [0, 0, 1, 1], [], []>} : vector<8x4xf32>, vector<4x256xf32>, vector<8x256xf32> -> vector<8x256xf32>
    %53 = arith.addf %48, %52 : vector<8x256xf32>
    %c0_33 = arith.constant 0 : index
    %c0_34 = arith.constant 0 : index
    %54 = vector.load %arg4[%c0_33, %c0_34] : memref<8x1xf32, #tpu.memory_space<vmem>>, vector<8x1xf32>
    %55 = vector.broadcast %54 : vector<8x1xf32> to vector<8x256xf32>
    %56 = arith.addf %53, %55 : vector<8x256xf32>
    %c0_35 = arith.constant 0 : index
    %c0_36 = arith.constant 0 : index
    %c0_37 = arith.constant 0 : index
    %57 = vector.load %arg5[%c0_35, %c0_36, %c0_37] : memref<1x8x256xf32, #tpu.memory_space<vmem>>, vector<1x8x256xf32>
    %58 = vector.shape_cast %57 : vector<1x8x256xf32> to vector<8x256xf32>
    %59 = vector.shape_cast %56 : vector<8x256xf32> to vector<1x8x256xf32>
    tpu.vector_store %arg5[%c0_35, %c0_36, %c0_37], %59 {strides = array<i32>} : memref<1x8x256xf32, #tpu.memory_space<vmem>>, vector<1x8x256xf32>,
    return
  }
  func.func @transform_0(%arg0: i32, %arg1: i32) -> (i32, i32, i32, i32) {
    %c0_i32 = arith.constant 0 : i32
    %c0_i32_0 = arith.constant 0 : i32
    %c0_i32_1 = arith.constant 0 : i32
    %c0_i32_2 = arith.constant 0 : i32
    return %arg0, %c0_i32, %c0_i32_0, %c0_i32_1 : i32, i32, i32, i32
  }
  func.func @transform_1(%arg0: i32, %arg1: i32) -> (i32, i32, i32) {
    %c0_i32 = arith.constant 0 : i32
    %c0_i32_0 = arith.constant 0 : i32
    %c0_i32_1 = arith.constant 0 : i32
    %c0_i32_2 = arith.constant 0 : i32
    return %c0_i32, %c0_i32_0, %c0_i32_1 : i32, i32, i32
  }
  func.func @transform_2(%arg0: i32, %arg1: i32) -> (i32, i32) {
    %c0_i32 = arith.constant 0 : i32
    %c0_i32_0 = arith.constant 0 : i32
    %c0_i32_1 = arith.constant 0 : i32
    return %c0_i32, %c0_i32_0 : i32, i32
  }
  func.func @transform_3(%arg0: i32, %arg1: i32) -> (i32, i32, i32) {
    %c0_i32 = arith.constant 0 : i32
    %c0_i32_0 = arith.constant 0 : i32
    return %arg0, %c0_i32, %arg1 : i32, i32, i32
  }
}

</mosaic_0001>

<bundles_post_ra>
// kernel: wn_conv2d.1
= control target key start
LH: loop header
LB: loop body
LE: loop exit
PB: predicated region body
PF: predicated region fallthrough
CT: control target
= control target key end

     0   :  { %s1017_s12 = smov 0   ;;  %s1019_s13 = smov 0   ;;  %s1148_s0 = inlined_call_operand.vmem [shape: f32[2,3,4,256], index: 0, kind: input, shape index: {}]   ;;  %s1149_s1 = inlined_call_operand.vmem [shape: f32[9,8,4], index: 1, kind: input, shape index: {}]   ;;  %s1150_s2 = inlined_call_operand.vmem [shape: f32[8,1], index: 2, kind: input, shape index: {}]   ;;  %s1151_s3 = inlined_call_operand.vmem [shape: f32[2,8,512], index: 3, kind: output, shape index: {}]  }
   0x1   :  { %s1021_s14 = smov 0   ;;  %s1023_s15 = smov 0  }
   0x2   :  { %s1025_s16 = smov 0  }
   0x3 LB: > { %s22_s17 = sadd.s32 1, %s978_s14  ;;  %s25_s18 = sadd.s32 1, %s982_s15  ;;  %s986_s16 = sphi %s1025_s16, %s13_s16   ;;  %s982_s15 = sphi %s1023_s15, %s1155_s15   ;;  %s978_s14 = sphi %s1021_s14, %s1154_s14   ;;  %s974_s13 = sphi %s1019_s13, %s1153_s13   ;;  %s970_s12 = sphi %s1017_s12, %s1152_s12  }
   0x4   : > { %p23_p0 = scmp.ge.s32.totalorder %s22_s17, 2  ;;  %p841_p1 = scmp.ge.s32.totalorder %s986_s16, 1 }
   0x5   : > { %p151_p2 = scmp.lt.s32.totalorder %s986_s16, 5 }
   0x6   : > { %s1157_s17 = smov (%p23_p0, %s22_s17), 0  ;;  %s1159_s18 = smov (!%p23_p0, %s25_s18), %s982_s15 }
   0x7   : > { %p152_p3 = pnand %p841_p1, %p151_p2  ;;  %p27_p4 = scmp.ge.s32.totalorder %s1159_s18, 2 }
   0x8   : > { %p179_p5 = scmp.lt.s32.totalorder (!%p152_p3), %s974_s13, 1  ;;  %s896_s20 = sshll.u32 (!%p152_p3), %s970_s12, 3 }
   0x9   : > { %s1161_s18 = smov (%p27_p4, %s1159_s18), 0  ;;  %155 = sbr.rel (%p152_p3) target bundleno = 333 (0x14d), region = 32 }
   0xa   : > { %s988_s25 = smov (!%p152_p3), 126   ;;  %s989_s26 = smov (!%p152_p3), 127  }
   0xb   : > { %s990_s27 = smov (!%p152_p3), 110   ;;  %s991_s28 = smov (!%p152_p3), 109  }
   0xc   : > { %s992_s29 = smov (!%p152_p3), 108   ;;  %s993_s30 = smov (!%p152_p3), 92  }
   0xd   : > { %s994_s4 = smov (!%p152_p3), 91   ;;  %s995_s5 = smov (!%p152_p3), 90  }
   0xe   : > { %s1163_s13 = smov (!%p179_p5, %s974_s13), 1  ;;  %vm226_vm0 = vcmask 1043456   ;;  %vm222_vm1 = vcmask 31744   ;;  %v210_v5 = vld [vmem:[%s1149_s1] sm:$0xff]  ;;  %vm219_vm2 = vcmask 1039360   ;;  %vm386_vm3 = vcmask 900096  }
   0xf   : > { %s897_s19 = smul.u32 24, %s1163_s13  ;;  %vm326_vm4 = vcmask 1031168   ;;  %v850_v15 = vld [vmem:[%s1149_s1 + $0x8] sm:$0xff]  ;;  %v864_v17 = vld [vmem:[%s1149_s1 + $0x18] sm:$0xff]  ;;  %v859_v22 = vld [vmem:[%s1149_s1 + $0x10] sm:$0xff]  ;;  %vm446_vm5 = vcmask 891904  }
  0x10   : > { %v869_v28 = vld [vmem:[%s1149_s1 + $0x20] sm:$0xff]  ;;  %v996_v32 = vmov 0   ;;  %vm506_vm6 = vcmask 883712   ;;  %v874_v35 = vld [vmem:[%s1149_s1 + $0x28] sm:$0xff]  ;;  %vm566_vm7 = vcmask 752640   ;;  %v879_v41 = vld [vmem:[%s1149_s1 + $0x30] sm:$0xff] }
  0x11   : > { %s183_s23 = scalar_lea.vmem %s1148_s0, %s897_s19  ;;  %v738_v30 = vld [vmem:[%s1150_s2] sm:$0xff]  ;;  %947 = vset.pattern.permute.xlu0 %v996_v32  ;;  %vm626_vm8 = vcmask 744448   ;;  %v884_v47 = vld [vmem:[%s1149_s1 + $0x38] sm:$0xff]  ;;  %vm686_vm9 = vcmask 736256   ;;  %s843_s6 = sshll.u32 %s970_s12, 1 }
  0x12   : > { %s196_s24 = scalar_lea.vmem %s183_s23, %s896_s20  ;;  %v889_v53 = vld [vmem:[%s1149_s1 + $0x40] sm:$0xff]  ;;  %p187_p6 = scmp.lt.s32.totalorder %s843_s6, 3 }
  0x13   : > { %v197_v0 = vld [vmem:[%s196_s24] sm:$0xff]  ;;  %v849_v1 = vld [vmem:[%s196_s24 + $0x8] sm:$0xff]  ;;  %s844_s7 = sshll.u32 %s1163_s13, 2 }
  0x14   : > { %204 = vst [vmem:[#allocation1] ss:$2 sm:$0xff] %v197_v0  ;;  %s1165_s6 = smov (!%p187_p6, %s843_s6), 3 }
  0x15   : > { %s190_s8 = sadd.s32 %s844_s7, %s1165_s6 }
  0x16   : > { %s845_s12 = sshll.u32 %s190_s8, 3 }
  0x17   : > { %s192_s11 = scalar_lea.vmem %s1151_s3, %s845_s12 }
  0x1b   : > { %v205_v2 = vld.sshfl [vmem:[#allocation1] sm:$0xff pattern:$0x75316420]  ;;  %v206_v3 = vld.sshfl [vmem:[#allocation1 + $0x8] sm:$0xff pattern:$0x75316420] }
  0x1c   : > { %320 = vrot.lane.b32.xlu1 %v205_v2, %s988_s25  ;;  %213 = vrot.lane.b32.xlu0 %v205_v2, %s989_s26  ;;  %208 = vst [vmem:[#allocation1] ss:$2 sm:$0xff] %v849_v1 }
  0x1d   : > { %322 = vrot.lane.b32.xlu2 %v206_v3, %s988_s25  ;;  %857 = vmatpush.msk.msra.mxu3 %vm226_vm0, %v206_v3 }
  0x1e   : > { %855 = vmatpush.msk.msra.mxu2 %vm226_vm0, %v205_v2  ;;  %858 = vmatmul.msk.f32.vlgmr.msra.gmra.mxu3 %vm222_vm1, %v210_v5 }
  0x1f   : > { %856 = vmatmul.msk.f32.vlgmr.msra.gmra.mxu2 %vm222_vm1, %v210_v5 }
  0x23   : > { %v209_v4 = vld.sshfl [vmem:[#allocation1] sm:$0xff pattern:$0x75316420] }
  0x24   : > { %382 = vrot.lane.b32.xlu1 %v206_v3, %s990_s27  ;;  %215 = vrot.lane.b32.xlu0 %v206_v3, %s989_s26 }
  0x25   : > { %324 = vrot.lane.b32.xlu2 %v209_v4, %s988_s25 }
  0x2c   : > { %442 = vrot.lane.b32.xlu1 %v206_v3, %s991_s28  ;;  %380 = vrot.lane.b32.xlu0 %v205_v2, %s990_s27 }
  0x2d   : > { %384 = vrot.lane.b32.xlu2 %v209_v4, %s990_s27 }
  0x34   : > { %440 = vrot.lane.b32.xlu0 %v205_v2, %s991_s28  ;;  %217 = vrot.lane.b32.xlu1 %v209_v4, %s989_s26 }
  0x35   : > { %444 = vrot.lane.b32.xlu2 %v209_v4, %s991_s28 }
  0x3c   : > { %500 = vrot.lane.b32.xlu0 %v205_v2, %s992_s29  ;;  %502 = vrot.lane.b32.xlu1 %v206_v3, %s992_s29 }
  0x3d   : > { %504 = vrot.lane.b32.xlu2 %v209_v4, %s992_s29 }
  0x44   : > { %560 = vrot.lane.b32.xlu0 %v205_v2, %s993_s30  ;;  %562 = vrot.lane.b32.xlu1 %v206_v3, %s993_s30 }
  0x45   : > { %564 = vrot.lane.b32.xlu2 %v209_v4, %s993_s30 }
  0x4c   : > { %620 = vrot.lane.b32.xlu0 %v205_v2, %s994_s4  ;;  %622 = vrot.lane.b32.xlu1 %v206_v3, %s994_s4 }
  0x4d   : > { %624 = vrot.lane.b32.xlu2 %v209_v4, %s994_s4 }
  0x54   : > { %680 = vrot.lane.b32.xlu0 %v205_v2, %s995_s5  ;;  %682 = vrot.lane.b32.xlu1 %v206_v3, %s995_s5 }
  0x55   : > { %684 = vrot.lane.b32.xlu2 %v209_v4, %s995_s5 }
  0x5c   : > { %741 = vperm.xlu0 %947, %v738_v30  }
  0x77   : > { %v323_v6 = vpop.permute.xlu2 %322 }
  0x7f   : > { %v325_v7 = vpop.permute.xlu2 %324 }
  0x80   : > { %v328_v29 = vsel %vm326_vm4, %v323_v6, %v325_v7 }
  0x87   : > { %v385_v10 = vpop.permute.xlu2 %384 }
  0x8e   : > { %v321_v8 = vpop.permute.xlu1 %320  ;;  %v214_v9 = vpop.permute.xlu0 %213 }
  0x8f   : > { %v327_v16 = vsel %vm326_vm4, %v321_v8, %v323_v6  ;;  %v445_v18 = vpop.permute.xlu2 %444 }
  0x96   : > { %v383_v11 = vpop.permute.xlu1 %382  ;;  %v216_v12 = vpop.permute.xlu0 %215 }
  0x97   : > { %v220_v13 = vsel %vm219_vm2, %v214_v9, %v216_v12  ;;  %v388_v14 = vsel %vm386_vm3, %v383_v11, %v385_v10  ;;  %v505_v23 = vpop.permute.xlu2 %504 }
  0x98   : > { %851 = vmatpush.msk.msra.mxu0 %vm226_vm0, %v220_v13  ;;  %867 = vmatpush.msk.msrb.mxu3 %vm226_vm0, %v388_v14 }
  0x99   : > { %868 = vmatmul.msk.f32.vlgmr.msrb.gmra.mxu3 %vm222_vm1, %v864_v17  ;;  %852 = vmatmul.msk.f32.vlgmr.msra.gmra.mxu0 %vm222_vm1, %v850_v15 }
  0x9a   : > { %860 = vmatpush.msk.msrb.mxu0 %vm226_vm0, %v327_v16 }
  0x9e   : > { %v443_v19 = vpop.permute.xlu1 %442  ;;  %v381_v20 = vpop.permute.xlu0 %380 }
  0x9f   : > { %v387_v21 = vsel %vm386_vm3, %v381_v20, %v383_v11  ;;  %v448_v31 = vsel %vm446_vm5, %v443_v19, %v445_v18  ;;  %v565_v38 = vpop.permute.xlu2 %564 }
  0xa0   : > { %865 = vmatpush.msk.msrb.mxu2 %vm226_vm0, %v387_v21 }
  0xa1   : > { %866 = vmatmul.msk.f32.vlgmr.msrb.gmra.mxu2 %vm222_vm1, %v864_v17  ;;  %861 = vmatmul.msk.f32.vlgmr.msrb.gmra.mxu0 %vm222_vm1, %v859_v22  ;;  %v315_v59 = vpop.f32.mrf.mxu3 }
  0xa2   : > { %v295_v58 = vpop.f32.mrf.mxu2 }
  0xa6   : > { %v441_v24 = vpop.permute.xlu0 %440  ;;  %v218_v25 = vpop.permute.xlu1 %217 }
  0xa7   : > { %v447_v26 = vsel %vm446_vm5, %v441_v24, %v443_v19  ;;  %v221_v27 = vsel %vm219_vm2, %v216_v12, %v218_v25  ;;  %v625_v44 = vpop.permute.xlu2 %624 }
  0xa8   : > { %853 = vmatpush.msk.msra.mxu1 %vm226_vm0, %v221_v27  ;;  %870 = vmatpush.msk.msra.mxu0 %vm226_vm0, %v447_v26 }
  0xa9   : > { %854 = vmatmul.msk.f32.vlgmr.msra.gmra.mxu1 %vm222_vm1, %v850_v15  ;;  %871 = vmatmul.msk.f32.vlgmr.msra.gmra.mxu0 %vm222_vm1, %v869_v28 }
  0xaa   : > { %862 = vmatpush.msk.msrb.mxu1 %vm226_vm0, %v328_v29 }
  0xac   : > { %872 = vmatpush.msk.msra.mxu1 %vm226_vm0, %v448_v31 }
  0xae   : > { %v501_v33 = vpop.permute.xlu0 %500  ;;  %v503_v34 = vpop.permute.xlu1 %502 }
  0xaf   : > { %v507_v36 = vsel %vm506_vm6, %v501_v33, %v503_v34  ;;  %v508_v37 = vsel %vm506_vm6, %v503_v34, %v505_v23  ;;  %v685_v50 = vpop.permute.xlu2 %684 }
  0xb0   : > { %875 = vmatpush.msk.msra.mxu2 %vm226_vm0, %v507_v36  ;;  %877 = vmatpush.msk.msra.mxu3 %vm226_vm0, %v508_v37 }
  0xb1   : > { %863 = vmatmul.msk.f32.vlgmr.msrb.gmra.mxu1 %vm222_vm1, %v859_v22  ;;  %876 = vmatmul.msk.f32.vlgmr.msra.gmra.mxu2 %vm222_vm1, %v874_v35 }
  0xb2   : > { %878 = vmatmul.msk.f32.vlgmr.msra.gmra.mxu3 %vm222_vm1, %v874_v35 }
  0xb6   : > { %v561_v39 = vpop.permute.xlu0 %560  ;;  %v563_v40 = vpop.permute.xlu1 %562 }
  0xb7   : > { %v567_v42 = vsel %vm566_vm7, %v561_v39, %v563_v40  ;;  %v568_v43 = vsel %vm566_vm7, %v563_v40, %v565_v38 }
  0xb8   : > { %880 = vmatpush.msk.msrb.mxu0 %vm226_vm0, %v567_v42  ;;  %882 = vmatpush.msk.msrb.mxu1 %vm226_vm0, %v568_v43 }
  0xb9   : > { %873 = vmatmul.msk.f32.vlgmr.msra.gmra.mxu1 %vm222_vm1, %v869_v28  ;;  %881 = vmatmul.msk.f32.vlgmr.msrb.gmra.mxu0 %vm222_vm1, %v879_v41 }
  0xbe   : > { %v621_v45 = vpop.permute.xlu0 %620  ;;  %v623_v46 = vpop.permute.xlu1 %622 }
  0xbf   : > { %v627_v48 = vsel %vm626_vm8, %v621_v45, %v623_v46  ;;  %v628_v49 = vsel %vm626_vm8, %v623_v46, %v625_v44 }
  0xc0   : > { %885 = vmatpush.msk.msrb.mxu2 %vm226_vm0, %v627_v48  ;;  %887 = vmatpush.msk.msrb.mxu3 %vm226_vm0, %v628_v49 }
  0xc1   : > { %883 = vmatmul.msk.f32.vlgmr.msrb.gmra.mxu1 %vm222_vm1, %v879_v41  ;;  %886 = vmatmul.msk.f32.vlgmr.msrb.gmra.mxu2 %vm222_vm1, %v884_v47 }
  0xc2   : > { %888 = vmatmul.msk.f32.vlgmr.msrb.gmra.mxu3 %vm222_vm1, %v884_v47 }
  0xc6   : > { %v681_v51 = vpop.permute.xlu0 %680  ;;  %v683_v52 = vpop.permute.xlu1 %682 }
  0xc7   : > { %v687_v54 = vsel %vm686_vm9, %v681_v51, %v683_v52  ;;  %v688_v55 = vsel %vm686_vm9, %v683_v52, %v685_v50 }
  0xc8   : > { %890 = vmatpush.msk.msra.mxu0 %vm226_vm0, %v687_v54  ;;  %892 = vmatpush.msk.msra.mxu1 %vm226_vm0, %v688_v55 }
  0xc9   : > { %891 = vmatmul.msk.f32.vlgmr.msra.gmra.mxu0 %vm222_vm1, %v889_v53  ;;  %893 = vmatmul.msk.f32.vlgmr.msra.gmra.mxu1 %vm222_vm1, %v889_v53 }
  0xce   : > { %v742_v21 = vpop.permute.xlu0 %741 }
 0x116   : > { %v248_v56 = vpop.f32.mrf.mxu0 }
 0x117   : > { %v296_v62 = vadd.f32 %v295_v58, %v248_v56 }
 0x11c   : > { %v433_v63 = vpop.f32.mrf.mxu3 }
 0x11e   : > { %v353_v60 = vpop.f32.mrf.mxu0 }
 0x11f   : > { %v376_v1 = vadd.f32 %v353_v60, %v296_v62 }
 0x124   : > { %v413_v0 = vpop.f32.mrf.mxu2 }
 0x125   : > { %v436_v6 = vadd.f32 %v413_v0, %v376_v1 }
 0x126   : > { %v268_v57 = vpop.f32.mrf.mxu1  ;;  %v473_v3 = vpop.f32.mrf.mxu0 }
 0x127   : > { %v316_v2 = vadd.f32 %v315_v59, %v268_v57  ;;  %v496_v9 = vadd.f32 %v473_v3, %v436_v6 }
 0x12e   : > { %v373_v61 = vpop.f32.mrf.mxu1 }
 0x12f   : > { %v377_v5 = vadd.f32 %v373_v61, %v316_v2 }
 0x131   : > { %v437_v7 = vadd.f32 %v433_v63, %v377_v5 }
 0x134   : > { %v533_v8 = vpop.f32.mrf.mxu2 }
 0x135   : > { %v553_v10 = vpop.f32.mrf.mxu3  ;;  %v556_v14 = vadd.f32 %v533_v8, %v496_v9 }
 0x136   : > { %v493_v4 = vpop.f32.mrf.mxu1  ;;  %v593_v12 = vpop.f32.mrf.mxu0 }
 0x137   : > { %v497_v11 = vadd.f32 %v493_v4, %v437_v7  ;;  %v616_v16 = vadd.f32 %v593_v12, %v556_v14 }
 0x139   : > { %v557_v15 = vadd.f32 %v553_v10, %v497_v11 }
 0x13e   : > { %v613_v13 = vpop.f32.mrf.mxu1 }
 0x13f   : > { %v617_v17 = vadd.f32 %v613_v13, %v557_v15 }
 0x144   : > { %v653_v18 = vpop.f32.mrf.mxu2 }
 0x145   : > { %v676_v19 = vadd.f32 %v653_v18, %v616_v16  ;;  %v673_v20 = vpop.f32.mrf.mxu3 }
 0x146   : > { %v677_v22 = vadd.f32 %v673_v20, %v617_v17  ;;  %v713_v23 = vpop.f32.mrf.mxu0  ;;  %v733_v24 = vpop.f32.mrf.mxu1 }
 0x147   : > { %v736_v25 = vadd.f32 %v713_v23, %v676_v19 }
 0x148   : > { %v737_v26 = vadd.f32 %v733_v24, %v677_v22 }
 0x149   : > { %v744_v27 = vadd.f32 %v742_v21, %v736_v25 }
 0x14a   : > { %v745_v28 = vadd.f32 %v742_v21, %v737_v26 }
 0x14b   : > { %746 = vst [vmem:[%s192_s11] sm:$0xff] %v744_v27 }
 0x14c   : > { %747 = vst [vmem:[%s192_s11 + $0x8] sm:$0xff] %v745_v28 }
 0x14d PF: > { %s13_s16 = sadd.s32 1, %s986_s16   ;;  %s1152_s12 = smov %s978_s14 }
 0x14e   : > { %p10_p7 = scmp.ge.s32.totalorder %s13_s16, 6   ;;  %s1153_s13 = smov %s982_s15 }
 0x14f   : > { %s1154_s14 = smov %s1157_s17  ;;  %s1155_s15 = smov %s1161_s18 }
 0x150   :  { %12 = sbr.rel (!%p10_p7) target bundleno = 3 (0x3), region = 72 }

</bundles_post_ra>
